<compile_context>
chip_gen: v6e
topology: v6e:2x2x1
jax: 0.10.0
libtpu: 0.0.40
codegen_flags: <defaults>
</compile_context>

<pallas_src>
import functools

import jax
import jax.numpy as jnp
from jax.experimental import pallas as pl
from jax.experimental.pallas import tpu as pltpu


def _hinge_small_kernel(x_ref, t_ref, out_ref, *, margin):
    """Single-block path for tiny inputs (block == full array)."""
    x = x_ref[...].astype(jnp.float32)
    t = t_ref[...].astype(jnp.float32)
    h = jnp.maximum(margin - x * t, 0.0)
    out_ref[0] = jnp.sum(h, axis=0, keepdims=True)          # (1, lanes) partial


def _hinge_block_kernel(x_ref, t_ref, out_ref, *, margin, rows, tile_rows,
                        lanes, sub, mask_tail):
    """Per-block lane-wise partial sums of max(0, margin - x*t).

    Streams (sub, lanes) chunks of the (tile_rows, lanes) block, folding each
    into an (8, lanes) f32 accumulator with pure VPU adds; a single cross-
    sublane reduce produces the (1, lanes) per-block partial.
    """
    i = pl.program_id(0)
    n_sub = tile_rows // sub

    def partial_sum(masked):
        if masked:
            # Hoisted out of the loop (JAX does not CSE broadcasts/iotas).
            row_iota = jax.lax.broadcasted_iota(jnp.int32, (sub, lanes), 0)
            block_base = i * tile_rows

        def chunk(c):
            r0 = c * sub
            if not isinstance(c, int):
                r0 = pl.multiple_of(r0, sub)
            xs = x_ref[pl.ds(r0, sub), :].astype(jnp.float32)
            ts = t_ref[pl.ds(r0, sub), :].astype(jnp.float32)
            h = jnp.maximum(margin - xs * ts, 0.0)
            if masked:
                # Over-read rows of the ragged last block hold garbage; the
                # select discards them (NaN/Inf safe) before accumulation.
                h = jnp.where(block_base + c * sub + row_iota < rows, h, 0.0)
            return h.reshape(sub // 8, 8, lanes).sum(axis=0)   # (8, lanes)

        if n_sub == 1:
            acc = chunk(0)
        else:
            acc = jax.lax.fori_loop(
                0, n_sub, lambda c, a: a + chunk(c),
                jnp.zeros((8, lanes), jnp.float32))
        # Single cross-sublane (XLU) reduce per block.
        out_ref[0] = jnp.sum(acc, axis=0, keepdims=True)

    if mask_tail:
        last = pl.num_programs(0) - 1

        @pl.when(i < last)          # all full blocks: no mask cost
        def _():
            partial_sum(False)

        @pl.when(i == last)         # only the ragged last block pays the mask
        def _():
            partial_sum(True)
    else:
        partial_sum(False)


def _make_in_spec(tile_rows, lanes, extra_buffering):
    if extra_buffering:
        try:
            return pl.BlockSpec((tile_rows, lanes), lambda i: (i, 0),
                                pipeline_mode=pl.Buffered(3))
        except TypeError:   # older jax without pipeline_mode kwarg
            pass
    return pl.BlockSpec((tile_rows, lanes), lambda i: (i, 0))


def hinge_loss_pallas(x, target, *, margin=1.0, target_block_bytes=None):
    """mean(max(0, margin - x*target)) via a Pallas TPU kernel."""
    assert x.shape == target.shape, "input/target shapes must match"
    total = int(x.size)
    assert total > 0, "empty input (PyTorch would return NaN)"
    margin = float(margin)                    # compile-time constant
    inv_count = 1.0 / float(total)

    # Per-generation block sizing: v7x has 64 MiB VMEM but 3.2 TB/s HBM, so
    # smaller blocks + deeper pipelining; v5e/v6e get 8 MiB blocks + 64 MiB cap.
    try:
        kind = jax.devices()[0].device_kind.lower()
    except Exception:                         # pragma: no cover
        kind = ""
    is_v7 = ("v7" in kind) or ("tpu7" in kind)
    if target_block_bytes is None:
        target_block_bytes = (4 << 20) if is_v7 else (8 << 20)
    vmem_limit = (32 << 20) if is_v7 else (64 << 20)

    xf = jnp.reshape(x, (-1,))
    tf = jnp.reshape(target, (-1,))

    # Widest lane dim that divides the element count -> copy-free reshape.
    # Otherwise lanes=128 and the < 128-element remainder is handled by the
    # wrapper below (no concatenate / full-array copy of the inputs).
    lanes = 128
    for cand in (1024, 512, 256, 128):
        if total % cand == 0:
            lanes = cand
            break
    main = (total // lanes) * lanes
    rows = main // lanes

    # Tail contribution (fewer than `lanes` elements) with plain jnp.
    if main < total:
        xt = xf[main:].astype(jnp.float32)
        tt = tf[main:].astype(jnp.float32)
        tail_sum = jnp.sum(jnp.maximum(margin - xt * tt, 0.0))
    else:
        tail_sum = None

    if rows == 0:
        # Entire input fit in the tail; nothing for the kernel to do.
        return tail_sum * inv_count

    x2 = (xf if main == total else xf[:main]).reshape(rows, lanes)
    t2 = (tf if main == total else tf[:main]).reshape(rows, lanes)

    # Sublane packing of the input dtypes (f32 -> 8, bf16 -> 16, int8 -> 32).
    row_align = max(8, 32 // int(x2.dtype.itemsize),
                    32 // int(t2.dtype.itemsize))
    # Rows per in-kernel chunk: ~256 KiB of f32 intermediates.
    sub = max(row_align, ((256 * 1024) // (lanes * 4)) // row_align * row_align)
    itemsize = max(int(x2.dtype.itemsize), int(t2.dtype.itemsize))

    if rows < sub:
        # Tiny input: one full-extent block, one-shot kernel.
        tile_rows = rows
        grid_blocks = 1
        kernel = functools.partial(_hinge_small_kernel, margin=margin)
    else:
        desired = max(sub, (target_block_bytes // (lanes * itemsize)) // sub * sub)
        tile_rows = min(desired, (rows // sub) * sub)
        grid_blocks = pl.cdiv(rows, tile_rows)
        mask_tail = (rows % tile_rows) != 0
        kernel = functools.partial(
            _hinge_block_kernel, margin=margin, rows=rows, tile_rows=tile_rows,
            lanes=lanes, sub=sub, mask_tail=mask_tail)

    extra_buf = is_v7 and grid_blocks >= 3
    partials = pl.pallas_call(
        kernel,
        out_shape=jax.ShapeDtypeStruct((grid_blocks, 1, lanes), jnp.float32),
        grid_spec=pltpu.PrefetchScalarGridSpec(
            num_scalar_prefetch=0,
            grid=(grid_blocks,),
            in_specs=[
                _make_in_spec(tile_rows, lanes, extra_buf),
                _make_in_spec(tile_rows, lanes, extra_buf),
            ],
            # Each block writes its own lane-dense partial -> no carried state,
            # so the axis is truly "parallel" (shards across v7x's 2 TCs).
            out_specs=pl.BlockSpec((1, 1, lanes), lambda i: (i, 0, 0)),
        ),
        compiler_params=pltpu.CompilerParams(
            dimension_semantics=("parallel",),
            vmem_limit_bytes=vmem_limit),
    )(x2, t2)

    total_sum = jnp.sum(partials)
    if tail_sum is not None:
        total_sum = total_sum + tail_sum
    return total_sum * inv_count


def hinge_loss_ref(x, target, margin=1.0):
    xf = x.astype(jnp.float32)
    tf = target.astype(jnp.float32)
    return jnp.mean(jnp.maximum(margin - xf * tf, 0.0))


def _pm1_targets(key, shape, dtype=jnp.float32):
    t = jnp.sign(jax.random.normal(key, shape, dtype=jnp.float32))
    t = jnp.where(t == 0, 1.0, t)
    return t.astype(dtype)


if __name__ == "__main__":
    key = jax.random.PRNGKey(0)
    k1, k2, k3, k4, k5, k6, k7, k8 = jax.random.split(key, 8)

    # 1) Module-consistent small shape: logits (batch=8, classes=32), +/-1 targets.
    x1 = jax.random.normal(k1, (8, 32), dtype=jnp.float32)
    t1 = _pm1_targets(k2, (8, 32))
    loss1 = hinge_loss_pallas(x1, t1)
    jax.block_until_ready(loss1)
    ref1 = hinge_loss_ref(x1, t1)
    assert jnp.allclose(loss1, ref1, atol=1e-5, rtol=1e-4), (loss1, ref1)

    # 2) Odd shape: exercises the wrapper lane-tail (no concatenate), the
    #    multi-block grid and the gated ragged-row mask (last block only).
    x2 = jax.random.normal(k3, (300, 257), dtype=jnp.float32)
    t2 = _pm1_targets(k4, (300, 257))
    loss2 = hinge_loss_pallas(x2, t2)
    jax.block_until_ready(loss2)
    ref2 = hinge_loss_ref(x2, t2)
    assert jnp.allclose(loss2, ref2, atol=1e-5, rtol=1e-4), (loss2, ref2)

    # 3) Forced-small blocks: multi-block grid + multi-chunk in-kernel fori_loop.
    x3 = jax.random.normal(k5, (512, 1024), dtype=jnp.float32)
    t3 = _pm1_targets(k6, (512, 1024))
    loss3 = hinge_loss_pallas(x3, t3, target_block_bytes=1 << 20)
    jax.block_until_ready(loss3)
    ref3 = hinge_loss_ref(x3, t3)
    assert jnp.allclose(loss3, ref3, atol=1e-5, rtol=1e-4), (loss3, ref3)

    # 4) bf16 inputs: sublane-packed tiles, in-kernel f32 upcast.
    x4 = jax.random.normal(k7, (64, 256), dtype=jnp.bfloat16)
    t4 = _pm1_targets(k8, (64, 256), dtype=jnp.bfloat16)
    loss4 = hinge_loss_pallas(x4, t4)
    jax.block_until_ready(loss4)
    ref4 = hinge_loss_ref(x4, t4)
    assert jnp.allclose(loss4, ref4, atol=1e-5, rtol=1e-4), (loss4, ref4)

    print("KERNEL_OK")
</pallas_src>

<mosaic_0001>
module attributes {stable_mosaic.version = 11 : i64} {
  func.func @_hinge_small_kernel(%arg0: i32, %arg1: memref<1x256xf32, #tpu.memory_space<vmem>>, %arg2: memref<1x256xf32, #tpu.memory_space<vmem>>, %arg3: memref<1x1x256xf32, #tpu.memory_space<vmem>>) attributes {dimension_semantics = [#tpu.dimension_semantics<parallel>], iteration_bounds = array<i64: 1>, scalar_prefetch = 0 : i64, scratch_operands = 0 : i64, tpu.core_type = #tpu.core_type<tc>, window_params = [{transform_indices = @transform_0, window_bounds = array<i64: 1, 256>}, {transform_indices = @transform_1, window_bounds = array<i64: 1, 256>}, {transform_indices = @transform_2, window_bounds = array<i64: 1, 1, 256>}]} {
    %c0 = arith.constant 0 : index
    %c0_0 = arith.constant 0 : index
    %0 = vector.load %arg1[%c0, %c0_0] : memref<1x256xf32, #tpu.memory_space<vmem>>, vector<1x256xf32>
    %c0_1 = arith.constant 0 : index
    %c0_2 = arith.constant 0 : index
    %1 = vector.load %arg2[%c0_1, %c0_2] : memref<1x256xf32, #tpu.memory_space<vmem>>, vector<1x256xf32>
    %2 = arith.mulf %0, %1 : vector<1x256xf32>
    %cst = arith.constant 1.000000e+00 : f32
    %3 = vector.broadcast %cst : f32 to vector<1x256xf32>
    %4 = arith.subf %3, %2 : vector<1x256xf32>
    %cst_3 = arith.constant 0.000000e+00 : f32
    %5 = vector.broadcast %cst_3 : f32 to vector<1x256xf32>
    %6 = arith.maximumf %4, %5 : vector<1x256xf32>
    %cst_4 = arith.constant dense<0.000000e+00> : vector<256xf32>
    %7 = vector.multi_reduction <add>, %6, %cst_4 [0] : vector<1x256xf32> to vector<256xf32>
    %8 = vector.shape_cast %7 : vector<256xf32> to vector<1x256xf32>
    %c0_5 = arith.constant 0 : index
    %c0_6 = arith.constant 0 : index
    %c0_7 = arith.constant 0 : index
    %9 = vector.load %arg3[%c0_5, %c0_6, %c0_7] : memref<1x1x256xf32, #tpu.memory_space<vmem>>, vector<1x1x256xf32>
    %10 = vector.shape_cast %9 : vector<1x1x256xf32> to vector<1x256xf32>
    %11 = vector.shape_cast %8 : vector<1x256xf32> to vector<1x1x256xf32>
    tpu.vector_store %arg3[%c0_5, %c0_6, %c0_7], %11 {strides = array<i32>} : memref<1x1x256xf32, #tpu.memory_space<vmem>>, vector<1x1x256xf32>,
    return
  }
  func.func @transform_0(%arg0: i32) -> (i32, i32) {
    %c0_i32 = arith.constant 0 : i32
    %c0_i32_0 = arith.constant 0 : i32
    return %arg0, %c0_i32 : i32, i32
  }
  func.func @transform_1(%arg0: i32) -> (i32, i32) {
    %c0_i32 = arith.constant 0 : i32
    %c0_i32_0 = arith.constant 0 : i32
    return %arg0, %c0_i32 : i32, i32
  }
  func.func @transform_2(%arg0: i32) -> (i32, i32, i32) {
    %c0_i32 = arith.constant 0 : i32
    %c0_i32_0 = arith.constant 0 : i32
    %c0_i32_1 = arith.constant 0 : i32
    return %arg0, %c0_i32, %c0_i32_0 : i32, i32, i32
  }
}

</mosaic_0001>

<bundles_post_ra>
// kernel: tpu_custom_call.1
= control target key start
LH: loop header
LB: loop body
LE: loop exit
PB: predicated region body
PF: predicated region fallthrough
CT: control target
= control target key end

     0   :  { %7 = vsyncpa [#allocation3], 0  ;;  %s159_s0 = inlined_call_operand.hbm [shape: f32[1,256], index: 0, kind: input, shape index: {}]   ;;  %s160_s1 = inlined_call_operand.hbm [shape: f32[1,256], index: 1, kind: input, shape index: {}]   ;;  %s161_s2 = inlined_call_operand.hbm [shape: f32[1,1,256], index: 2, kind: output, shape index: {}]  }
   0x1   :  { %8 = vsyncpa [#allocation6], 0 }
   0x2   :  { %9 = vsyncpa [#allocation4], 0  ;;  %s132_s9 = smov [#allocation2]   ;;  %s133_s11 = smov [#allocation5]  }
   0x3   :  { %s16_s10 = sshll.u32 %s132_s9, 4  ;;  %s26_s12 = sshll.u32 %s133_s11, 4  ;;  %s17_s10 = int_to_ptr.vmem [resolvable:$true] %s16_s10  ;;  %s27_s12 = int_to_ptr.vmem [resolvable:$true] %s26_s12 }
   0x4   :  { %s74_s13 = scalar_lea.vmem %s17_s10, 32  ;;  %p79_p1 = scmp.lt.s32.totalorder %s17_s10, %s17_s10 }
   0x5   :  { %p75_p0 = scmp.ne.s32.totalorder %s17_s10, %s74_s13  ;;  %p80_p2 = scmp.lt.s32.totalorder %s74_s13, %s74_s13 }
   0x7   :  { %p81_p3 = por %p80_p2, %p79_p1 }
   0x9   :  { %p82_p4 = pnand %p81_p3, %p75_p0 }
   0xb   :  { %85 = shalt.err (!%p82_p4)
}
   0xc   :  { %19 = dma.hbm_to_vmem [thread:$0]  %s159_s0, 32, %s17_s10, [#allocation3]  }
   0xd   :  { %s94_s16 = scalar_lea.vmem %s27_s12, 32  ;;  %p99_p6 = scmp.lt.s32.totalorder %s27_s12, %s27_s12 }
   0xe   :  { %p95_p5 = scmp.ne.s32.totalorder %s27_s12, %s94_s16  ;;  %p100_p7 = scmp.lt.s32.totalorder %s94_s16, %s94_s16 }
  0x10   :  { %p101_p8 = por %p100_p7, %p99_p6 }
  0x12   :  { %p102_p9 = pnand %p101_p8, %p95_p5 }
  0x14   :  { %105 = shalt.err (!%p102_p9)
}
  0x15   :  { %29 = dma.hbm_to_vmem [thread:$0]  %s160_s1, 32, %s27_s12, [#allocation6]  }
  0x16   :  { %126 = dma.done.wait [#allocation3], 32  }
  0x17   :  { %127 = vsyncadd [#allocation3], 4294967264 }
  0x18   :  { %128 = dma.done.wait [#allocation6], 32  }
  0x19   :  { %129 = vsyncadd [#allocation6], 4294967264  ;;  %v36_v0 = vld [vmem:[#allocation2] sm:$0x3]  ;;  %v37_v1 = vld [vmem:[#allocation5] sm:$0x3]  ;;  %v42_v2 = vlaneseq }
  0x1a   :  { %v38_v3 = vmul.f32 %v37_v1, %v36_v0  ;;  %s134_s0 = smov [#allocation7]  }
  0x1b   :  { %s53_s19 = sshll.u32 %s134_s0, 4  ;;  %vm44_vm0 = vcmp.lt.s32.totalorder %v42_v2, 256  ;;  %s54_s19 = int_to_ptr.vmem [resolvable:$true] %s53_s19 }
  0x1c   :  { %v39_v4 = vsub.f32 1.0, %v38_v3  ;;  %s106_s20 = scalar_lea.vmem %s54_s19, 32  ;;  %p111_p11 = scmp.lt.s32.totalorder %s54_s19, %s54_s19 }
  0x1d   :  { %p107_p10 = scmp.ne.s32.totalorder %s54_s19, %s106_s20  ;;  %p112_p12 = scmp.lt.s32.totalorder %s106_s20, %s106_s20 }
  0x1e   :  { %v40_v5 = vmax.f32 %v39_v4, 0.0 }
  0x1f   :  { %p113_p13 = por %p112_p12, %p111_p11 }
  0x20   :  { %46 = vst.msk [vmem:[#allocation7] sm:$0x3] %vm44_vm0, %v40_v5 }
  0x21   :  { %p114_p0 = pnand %p113_p13, %p107_p10 }
  0x23   :  { %117 = shalt.err (!%p114_p0)
}
  0x24   :  { %56 = dma.vmem_to_hbm [thread:$0]  %s54_s19, 32, %s161_s2, [#allocation4]  }
  0x25   :  { %130 = dma.done.wait [#allocation4], 32  }
  0x26   :  { %131 = vsyncadd [#allocation4], 4294967264 }
  0x27   :  { %60 = vsyncpa [#allocation3], 1 }
  0x28   :  { %61 = vsyncpa [#allocation6], 1 }
  0x29   :  { %62 = vsyncpa [#allocation4], 1 }

</bundles_post_ra>
